<compile_context>
chip_gen: v5e
topology: v5e:2x2
jax: 0.10.0
libtpu: 0.0.40
codegen_flags: <defaults>
</compile_context>

<pallas_src>
import jax
import jax.numpy as jnp
from jax.experimental import pallas as pl
from jax.experimental.pallas import tpu as pltpu

LANES = 128


def _round_up(x: int, m: int) -> int:
    return ((x + m - 1) // m) * m


def _device_kind() -> str:
    try:
        return jax.devices()[0].device_kind.lower()
    except Exception:
        return ""


def _default_tile_rows() -> int:
    # v6e / v7x: 32 MiB scoped-VMEM default -> 8192-row tiles
    # (2 inputs x 2 pipeline buffers x 4 MiB = 16 MiB of input windows).
    # Older / unknown chips (v5e: 16 MiB scoped default) -> 4096-row tiles.
    kind = _device_kind()
    if any(t in kind for t in ("v6", "v7", "7x")):
        return 8192
    return 4096


def _default_num_shards() -> int:
    # Only v7x-class chips have 2 TensorCores; on 1-TC chips a second shard
    # is just a serial loop plus a wasted duplicated block read.
    kind = _device_kind()
    if any(t in kind for t in ("v7", "7x")):
        return 2
    return 1


def pixel_loss(fitxs: jax.Array, labels: jax.Array, *,
               max_tile_rows: int | None = None,
               num_shards: int | None = None) -> jax.Array:
    """MSE loss (mean over all elements), matching torch.nn.MSELoss()."""
    assert fitxs.shape == labels.shape, "FItxs and labels must have same shape"
    n_elems = fitxs.size
    assert n_elems > 0

    x = fitxs.reshape(-1)
    y = labels.reshape(-1)

    rows = n_elems // LANES          # lane-aligned prefix rows
    n_prefix = rows * LANES
    n_tail = n_elems - n_prefix      # <= 127 ragged elements

    tail_sum = jnp.float32(0.0)
    if n_tail:
        # Tiny ragged tail: cheaper as a wrapper-side sum than a full
        # jnp.pad HBM copy of both inputs.
        dt = x[n_prefix:].astype(jnp.float32) - y[n_prefix:].astype(jnp.float32)
        tail_sum = jnp.sum(dt * dt)

    if rows == 0:
        # Fewer than 128 elements total: nothing for the kernel to stream.
        return (tail_sum / jnp.float32(n_elems)).astype(jnp.float32)

    x2d = (x[:n_prefix] if n_tail else x).reshape(rows, LANES)
    y2d = (y[:n_prefix] if n_tail else y).reshape(rows, LANES)

    tile_cap = max_tile_rows if max_tile_rows is not None else _default_tile_rows()
    # Round the sublane dim to 32 so the block stays layout-legal for
    # f32 / bf16 / int8 inputs even when rows is small.
    tile_rows = min(_round_up(tile_cap, 32), _round_up(rows, 32))
    total_blocks = pl.cdiv(rows, tile_rows)

    shards = num_shards if num_shards is not None else _default_num_shards()
    shards = max(1, min(shards, total_blocks))
    steps = pl.cdiv(total_blocks, shards)
    n_full_blocks = rows // tile_rows   # blocks whose rows are all valid data
    sub_groups = tile_rows // 8

    def kernel(x_ref, y_ref, o_ref, acc_ref):
        s = pl.program_id(0)   # shard axis (parallel -> megacore on 2-TC chips)
        j = pl.program_id(1)   # streaming / reduction axis within the shard

        @pl.when(j == 0)
        def _():
            acc_ref[...] = jnp.zeros_like(acc_ref)

        d = x_ref[...].astype(jnp.float32) - y_ref[...].astype(jnp.float32)
        d2 = d * d

        bi = s * steps + j     # unclamped logical block index

        @pl.when(bi < n_full_blocks)
        def _():
            # Fast path: every row of this block is valid data.  Pure VPU
            # vreg-wise add tree into the (8, LANES) accumulator.
            acc_ref[...] += jnp.sum(d2.reshape(sub_groups, 8, LANES), axis=0)

        @pl.when(bi >= n_full_blocks)
        def _():
            # Tail block (rows past the real row count are block padding) or
            # duplicated clamped block (bi >= total_blocks): row-level mask
            # only — the lane dimension is always fully valid.
            row = jax.lax.broadcasted_iota(jnp.int32, (tile_rows, 1), 0)
            valid = (bi * tile_rows + row) < rows
            d2m = jnp.where(valid, d2, 0.0)
            acc_ref[...] += jnp.sum(d2m.reshape(sub_groups, 8, LANES), axis=0)

        @pl.when(j == pl.num_programs(1) - 1)
        def _():
            # Single cross-sublane + cross-lane reduce per shard.
            o_ref[0, 0] = jnp.sum(acc_ref[...])

    def in_index(s, j):
        # Clamp so duplicated tail steps never DMA out of bounds; their
        # contribution is masked to zero in-kernel (bi >= n_full_blocks).
        return (jnp.minimum(s * steps + j, total_blocks - 1), 0)

    partials = pl.pallas_call(
        kernel,
        out_shape=jax.ShapeDtypeStruct((shards, 1), jnp.float32),
        grid_spec=pltpu.PrefetchScalarGridSpec(
            num_scalar_prefetch=0,
            grid=(shards, steps),
            in_specs=[
                pl.BlockSpec((tile_rows, LANES), in_index),
                pl.BlockSpec((tile_rows, LANES), in_index),
            ],
            out_specs=pl.BlockSpec(
                (1, 1), lambda s, j: (s, 0), memory_space=pltpu.SMEM
            ),
            scratch_shapes=[pltpu.VMEM((8, LANES), jnp.float32)],
        ),
        compiler_params=pltpu.CompilerParams(
            dimension_semantics=("parallel", "arbitrary"),
        ),
        cost_estimate=pl.CostEstimate(
            flops=3 * n_elems,
            transcendentals=0,
            bytes_accessed=x2d.nbytes + y2d.nbytes + shards * 4,
        ),
    )(x2d, y2d)

    return ((jnp.sum(partials) + tail_sum) / jnp.float32(n_elems)).astype(jnp.float32)


if __name__ == "__main__":
    key = jax.random.PRNGKey(0)
    k1, k2, k3, k4, k5, k6 = jax.random.split(key, 6)

    # Primary example: (S, B, C, H, W) video-stabilization style shapes.
    S, B, C, H, W = 8, 2, 4, 16, 16
    fitxs = jax.random.normal(k1, (S, B, C, H, W), dtype=jnp.float32)
    labels = jax.random.normal(k2, (S, B, C, H, W), dtype=jnp.float32)
    loss = pixel_loss(fitxs, labels)
    jax.block_until_ready(loss)
    ref = jnp.mean((fitxs - labels) ** 2)
    assert jnp.allclose(loss, ref, rtol=1e-5, atol=1e-6), (loss, ref)

    # Non-lane-aligned element count: aligned-prefix kernel + wrapper tail sum.
    a = jax.random.normal(k3, (3, 2, 3, 7, 5), dtype=jnp.float32)
    b = jax.random.normal(k4, (3, 2, 3, 7, 5), dtype=jnp.float32)
    loss2 = pixel_loss(a, b)
    ref2 = jnp.mean((a - b) ** 2)
    assert jnp.allclose(loss2, ref2, rtol=1e-5, atol=1e-6), (loss2, ref2)

    # Multi-block, two-shard path with a partial last block AND a duplicated
    # clamped step (small tile cap forced to exercise the masked branch).
    c = jax.random.normal(k5, (3, 2, 4, 32, 33), dtype=jnp.float32)
    d = jax.random.normal(k6, (3, 2, 4, 32, 33), dtype=jnp.float32)
    loss3 = pixel_loss(c, d, max_tile_rows=32, num_shards=2)
    ref3 = jnp.mean((c - d) ** 2)
    assert jnp.allclose(loss3, ref3, rtol=1e-5, atol=1e-6), (loss3, ref3)

    jax.block_until_ready((loss2, loss3))
    print("KERNEL_OK")
</pallas_src>

<mosaic_0001>
module attributes {stable_mosaic.version = 11 : i64} {
  func.func @kernel(%arg0: i32, %arg1: i32, %arg2: memref<128x128xf32, #tpu.memory_space<vmem>>, %arg3: memref<128x128xf32, #tpu.memory_space<vmem>>, %arg4: memref<1x1xf32, #tpu.memory_space<smem>>, %arg5: memref<8x128xf32, #tpu.memory_space<vmem>>) attributes {dimension_semantics = [#tpu.dimension_semantics<parallel>, #tpu.dimension_semantics<arbitrary>], iteration_bounds = array<i64: 1, 1>, scalar_prefetch = 0 : i64, scratch_operands = 1 : i64, tpu.core_type = #tpu.core_type<tc>, window_params = [{transform_indices = @transform_0, window_bounds = array<i64: 128, 128>}, {transform_indices = @transform_1, window_bounds = array<i64: 128, 128>}, {transform_indices = @transform_2, window_bounds = array<i64: 1, 1>}]} {
    %c0_i32 = arith.constant 0 : i32
    %0 = arith.cmpi eq, %arg1, %c0_i32 : i32
    %1 = arith.extui %0 : i1 to i32
    %c0_i32_0 = arith.constant 0 : i32
    %2 = arith.cmpi ne, %1, %c0_i32_0 : i32
    scf.if %2 {
      %cst = arith.constant 0.000000e+00 : f32
      %18 = vector.broadcast %cst : f32 to vector<8x128xf32>
      %c0_10 = arith.constant 0 : index
      %c0_11 = arith.constant 0 : index
      %19 = vector.load %arg5[%c0_10, %c0_11] : memref<8x128xf32, #tpu.memory_space<vmem>>, vector<8x128xf32>
      tpu.vector_store %arg5[%c0_10, %c0_11], %18 {strides = array<i32>} : memref<8x128xf32, #tpu.memory_space<vmem>>, vector<8x128xf32>,
    } else {
    }
    %c0 = arith.constant 0 : index
    %c0_1 = arith.constant 0 : index
    %3 = vector.load %arg2[%c0, %c0_1] : memref<128x128xf32, #tpu.memory_space<vmem>>, vector<128x128xf32>
    %c0_2 = arith.constant 0 : index
    %c0_3 = arith.constant 0 : index
    %4 = vector.load %arg3[%c0_2, %c0_3] : memref<128x128xf32, #tpu.memory_space<vmem>>, vector<128x128xf32>
    %5 = arith.subf %3, %4 : vector<128x128xf32>
    %6 = arith.mulf %5, %5 : vector<128x128xf32>
    %c1_i32 = arith.constant 1 : i32
    %7 = arith.muli %arg0, %c1_i32 : i32
    %8 = arith.addi %7, %arg1 : i32
    %c1_i32_4 = arith.constant 1 : i32
    %9 = arith.cmpi slt, %8, %c1_i32_4 : i32
    %10 = arith.extui %9 : i1 to i32
    %c0_i32_5 = arith.constant 0 : i32
    %11 = arith.cmpi ne, %10, %c0_i32_5 : i32
    scf.if %11 {
      %c0_10 = arith.constant 0 : index
      %c0_11 = arith.constant 0 : index
      %18 = vector.load %arg5[%c0_10, %c0_11] : memref<8x128xf32, #tpu.memory_space<vmem>>, vector<8x128xf32>
      %19 = vector.shape_cast %6 : vector<128x128xf32> to vector<16x8x128xf32>
      %cst = arith.constant dense<0.000000e+00> : vector<8x128xf32>
      %20 = vector.multi_reduction <add>, %19, %cst [0] : vector<16x8x128xf32> to vector<8x128xf32>
      %21 = arith.addf %18, %20 : vector<8x128xf32>
      %c0_12 = arith.constant 0 : index
      %c0_13 = arith.constant 0 : index
      %22 = vector.load %arg5[%c0_12, %c0_13] : memref<8x128xf32, #tpu.memory_space<vmem>>, vector<8x128xf32>
      tpu.vector_store %arg5[%c0_12, %c0_13], %21 {strides = array<i32>} : memref<8x128xf32, #tpu.memory_space<vmem>>, vector<8x128xf32>,
    } else {
    }
    %c1_i32_6 = arith.constant 1 : i32
    %12 = arith.cmpi sge, %8, %c1_i32_6 : i32
    %13 = arith.extui %12 : i1 to i32
    %c0_i32_7 = arith.constant 0 : i32
    %14 = arith.cmpi ne, %13, %c0_i32_7 : i32
    scf.if %14 {
      %18 = tpu.iota {dimensions = array<i32: 0>} : vector<128x1xi32>
      %c128_i32 = arith.constant 128 : i32
      %19 = arith.muli %8, %c128_i32 : i32
      %20 = vector.broadcast %19 : i32 to vector<128x1xi32>
      %21 = arith.addi %20, %18 : vector<128x1xi32>
      %c128_i32_10 = arith.constant 128 : i32
      %22 = vector.broadcast %c128_i32_10 : i32 to vector<128x1xi32>
      %23 = arith.cmpi slt, %21, %22 : vector<128x1xi32>
      %cst = arith.constant 0.000000e+00 : f32
      %24 = vector.shape_cast %23 : vector<128x1xi1> to vector<128x1xi1>
      %25 = vector.broadcast %24 : vector<128x1xi1> to vector<128x128xi1>
      %26 = vector.broadcast %cst : f32 to vector<128x128xf32>
      %27 = arith.select %25, %6, %26 : vector<128x128xi1>, vector<128x128xf32>
      %c0_11 = arith.constant 0 : index
      %c0_12 = arith.constant 0 : index
      %28 = vector.load %arg5[%c0_11, %c0_12] : memref<8x128xf32, #tpu.memory_space<vmem>>, vector<8x128xf32>
      %29 = vector.shape_cast %27 : vector<128x128xf32> to vector<16x8x128xf32>
      %cst_13 = arith.constant dense<0.000000e+00> : vector<8x128xf32>
      %30 = vector.multi_reduction <add>, %29, %cst_13 [0] : vector<16x8x128xf32> to vector<8x128xf32>
      %31 = arith.addf %28, %30 : vector<8x128xf32>
      %c0_14 = arith.constant 0 : index
      %c0_15 = arith.constant 0 : index
      %32 = vector.load %arg5[%c0_14, %c0_15] : memref<8x128xf32, #tpu.memory_space<vmem>>, vector<8x128xf32>
      tpu.vector_store %arg5[%c0_14, %c0_15], %31 {strides = array<i32>} : memref<8x128xf32, #tpu.memory_space<vmem>>, vector<8x128xf32>,
    } else {
    }
    %c0_i32_8 = arith.constant 0 : i32
    %15 = arith.cmpi eq, %arg1, %c0_i32_8 : i32
    %16 = arith.extui %15 : i1 to i32
    %c0_i32_9 = arith.constant 0 : i32
    %17 = arith.cmpi ne, %16, %c0_i32_9 : i32
    scf.if %17 {
      %c0_10 = arith.constant 0 : index
      %c0_11 = arith.constant 0 : index
      %18 = vector.load %arg5[%c0_10, %c0_11] : memref<8x128xf32, #tpu.memory_space<vmem>>, vector<8x128xf32>
      %19 = vector.shape_cast %18 : vector<8x128xf32> to vector<1x8x128xf32>
      %cst = arith.constant dense<0.000000e+00> : vector<1xf32>
      %20 = vector.multi_reduction <add>, %19, %cst [1, 2] : vector<1x8x128xf32> to vector<1xf32>
      %21 = vector.shape_cast %20 : vector<1xf32> to vector<1x1x1xf32>
      %22 = vector.extract %21[0, 0, 0] : f32 from vector<1x1x1xf32>
      %c0_12 = arith.constant 0 : index
      %c0_13 = arith.constant 0 : index
      %23 = memref.load %arg4[%c0_12, %c0_13] : memref<1x1xf32, #tpu.memory_space<smem>>
      memref.store %22, %arg4[%c0_12, %c0_13] : memref<1x1xf32, #tpu.memory_space<smem>>
    } else {
    }
    return
  }
  func.func @transform_0(%arg0: i32, %arg1: i32) -> (i32, i32) {
    %c1_i32 = arith.constant 1 : i32
    %0 = arith.muli %arg0, %c1_i32 : i32
    %1 = arith.addi %0, %arg1 : i32
    %c0_i32 = arith.constant 0 : i32
    %2 = arith.minsi %1, %c0_i32 : i32
    %c0_i32_0 = arith.constant 0 : i32
    %c0_i32_1 = arith.constant 0 : i32
    return %2, %c0_i32_0 : i32, i32
  }
  func.func @transform_1(%arg0: i32, %arg1: i32) -> (i32, i32) {
    %c1_i32 = arith.constant 1 : i32
    %0 = arith.muli %arg0, %c1_i32 : i32
    %1 = arith.addi %0, %arg1 : i32
    %c0_i32 = arith.constant 0 : i32
    %2 = arith.minsi %1, %c0_i32 : i32
    %c0_i32_0 = arith.constant 0 : i32
    %c0_i32_1 = arith.constant 0 : i32
    return %2, %c0_i32_0 : i32, i32
  }
  func.func @transform_2(%arg0: i32, %arg1: i32) -> (i32, i32) {
    %c0_i32 = arith.constant 0 : i32
    %c0_i32_0 = arith.constant 0 : i32
    return %arg0, %c0_i32 : i32, i32
  }
}

</mosaic_0001>

<bundles_post_ra>
// kernel: tpu_custom_call.1
= control target key start
LH: loop header
LB: loop body
LE: loop exit
PB: predicated region body
PF: predicated region fallthrough
CT: control target
= control target key end

     0   :  { %7 = vsyncpa [#allocation4], 0  ;;  %s415_s0 = inlined_call_operand.hbm [shape: f32[128,128], index: 0, kind: input, shape index: {}]   ;;  %s416_s1 = inlined_call_operand.hbm [shape: f32[128,128], index: 1, kind: input, shape index: {}]   ;;  %s417_s2 = inlined_call_operand.hbm [shape: f32[1,1], index: 2, kind: output, shape index: {}]  }
   0x1   :  { %8 = vsyncpa [#allocation7], 0 }
   0x2   :  { %9 = vsyncpa [#allocation5], 0  ;;  %s20_s11 = sshll.u32 %s415_s0, 4  ;;  %s386_s12 = smov [#allocation3]   ;;  %s21_s11 = int_to_ptr.hbm [resolvable:$true] %s20_s11 }
   0x3   :  { %s22_s13 = sshll.u32 %s386_s12, 4  ;;  %s39_s16 = sshll.u32 %s416_s1, 4  ;;  %s23_s13 = int_to_ptr.vmem [resolvable:$true] %s22_s13  ;;  %s40_s16 = int_to_ptr.hbm [resolvable:$true] %s39_s16 }
   0x4   :  { %s387_s17 = smov 128   ;;  %s388_s18 = smov 8  }
   0x5   :  { %28 = dma.hbm_to_vmem [thread:$0]  %s21_s11, 2048, %s23_s13, [#allocation4], %s387_s17, %s387_s17, %s388_s18  }
   0x6   :  { %s389_s19 = smov [#allocation6]  }
   0x7   :  { %s41_s20 = sshll.u32 %s389_s19, 4  ;;  %s42_s20 = int_to_ptr.vmem [resolvable:$true] %s41_s20 }
   0x8   :  { %47 = dma.hbm_to_vmem [thread:$0]  %s40_s16, 2048, %s42_s20, [#allocation7], %s387_s17, %s387_s17, %s388_s18  }
   0x9   :  { %380 = dma.done.wait [#allocation4], 2048  }
   0xa   :  { %381 = vsyncadd [#allocation4], 4294965248 }
   0xb   :  { %382 = dma.done.wait [#allocation7], 2048  }
   0xc   :  { %383 = vsyncadd [#allocation7], 4294965248  ;;  %v69_v0 = vld [vmem:[#allocation3] sm:$0xff]  ;;  %v70_v1 = vld [vmem:[#allocation3 + $0x8] sm:$0xff]  ;;  %s297_s21 = sshll.u32 %s417_s2, 4  ;;  %s390_s23 = smov [#allocation8]   ;;  %s298_s21 = int_to_ptr.hbm [resolvable:$true] %s297_s21 }
   0xd   :  { %v71_v2 = vld [vmem:[#allocation3 + $0x10] sm:$0xff]  ;;  %v85_v3 = vld [vmem:[#allocation6] sm:$0xff]  ;;  %v86_v4 = vld [vmem:[#allocation6 + $0x8] sm:$0xff] }
   0xe   :  { %v87_v5 = vld [vmem:[#allocation6 + $0x10] sm:$0xff]  ;;  %v101_v6 = vsub.f32 %v69_v0, %v85_v3  ;;  %v102_v7 = vsub.f32 %v70_v1, %v86_v4  ;;  %v72_v8 = vld [vmem:[#allocation3 + $0x18] sm:$0xff]  ;;  %v73_v11 = vld [vmem:[#allocation3 + $0x20] sm:$0xff] }
   0xf   :  { %v88_v9 = vld [vmem:[#allocation6 + $0x18] sm:$0xff]  ;;  %v103_v10 = vsub.f32 %v71_v2, %v87_v5  ;;  %v89_v12 = vld [vmem:[#allocation6 + $0x20] sm:$0xff]  ;;  %v74_v16 = vld [vmem:[#allocation3 + $0x28] sm:$0xff] }
  0x10   :  { %v104_v13 = vsub.f32 %v72_v8, %v88_v9  ;;  %v117_v14 = vmul.f32 %v101_v6, %v101_v6  ;;  %v118_v15 = vmul.f32 %v102_v7, %v102_v7  ;;  %v90_v17 = vld [vmem:[#allocation6 + $0x28] sm:$0xff]  ;;  %v105_v18 = vsub.f32 %v73_v11, %v89_v12  ;;  %v75_v20 = vld [vmem:[#allocation3 + $0x30] sm:$0xff]  ;;  %v76_v25 = vld [vmem:[#allocation3 + $0x38] sm:$0xff] }
  0x11   :  { %v119_v19 = vmul.f32 %v103_v10, %v103_v10  ;;  %v91_v21 = vld [vmem:[#allocation6 + $0x30] sm:$0xff]  ;;  %v106_v22 = vsub.f32 %v74_v16, %v90_v17  ;;  %v92_v26 = vld [vmem:[#allocation6 + $0x38] sm:$0xff]  ;;  %v77_v30 = vld [vmem:[#allocation3 + $0x40] sm:$0xff] }
  0x12   :  { %v120_v23 = vmul.f32 %v104_v13, %v104_v13  ;;  %v139_v24 = vadd.f32 %v118_v15, %v117_v14  ;;  %v107_v27 = vsub.f32 %v75_v20, %v91_v21  ;;  %v121_v28 = vmul.f32 %v105_v18, %v105_v18  ;;  %v93_v31 = vld [vmem:[#allocation6 + $0x40] sm:$0xff]  ;;  %v78_v35 = vld [vmem:[#allocation3 + $0x48] sm:$0xff]  ;;  %v79_v40 = vld [vmem:[#allocation3 + $0x50] sm:$0xff] }
  0x13   :  { %v108_v32 = vsub.f32 %v76_v25, %v92_v26  ;;  %v122_v33 = vmul.f32 %v106_v22, %v106_v22  ;;  %v94_v36 = vld [vmem:[#allocation6 + $0x48] sm:$0xff]  ;;  %v109_v37 = vsub.f32 %v77_v30, %v93_v31  ;;  %v95_v41 = vld [vmem:[#allocation6 + $0x50] sm:$0xff]  ;;  %v80_v45 = vld [vmem:[#allocation3 + $0x58] sm:$0xff] }
  0x14   :  { %v140_v29 = vadd.f32 %v139_v24, %v119_v19  ;;  %v123_v38 = vmul.f32 %v107_v27, %v107_v27  ;;  %v110_v42 = vsub.f32 %v78_v35, %v94_v36  ;;  %v96_v46 = vld [vmem:[#allocation6 + $0x58] sm:$0xff]  ;;  %v111_v47 = vsub.f32 %v79_v40, %v95_v41  ;;  %v81_v50 = vld [vmem:[#allocation3 + $0x60] sm:$0xff]  ;;  %v82_v55 = vld [vmem:[#allocation3 + $0x68] sm:$0xff] }
  0x15   :  { %v124_v43 = vmul.f32 %v108_v32, %v108_v32  ;;  %v125_v48 = vmul.f32 %v109_v37, %v109_v37  ;;  %v97_v51 = vld [vmem:[#allocation6 + $0x60] sm:$0xff]  ;;  %v112_v52 = vsub.f32 %v80_v45, %v96_v46  ;;  %v98_v56 = vld [vmem:[#allocation6 + $0x68] sm:$0xff]  ;;  %v83_v60 = vld [vmem:[#allocation3 + $0x70] sm:$0xff] }
  0x16   :  { %v141_v34 = vadd.f32 %v140_v29, %v120_v23  ;;  %v126_v53 = vmul.f32 %v110_v42, %v110_v42  ;;  %v113_v57 = vsub.f32 %v81_v50, %v97_v51  ;;  %v127_v58 = vmul.f32 %v111_v47, %v111_v47  ;;  %v99_v61 = vld [vmem:[#allocation6 + $0x70] sm:$0xff]  ;;  %v84_v1 = vld [vmem:[#allocation3 + $0x78] sm:$0xff] }
  0x17   :  { %v114_v62 = vsub.f32 %v82_v55, %v98_v56  ;;  %v128_v63 = vmul.f32 %v112_v52, %v112_v52  ;;  %v100_v2 = vld [vmem:[#allocation6 + $0x78] sm:$0xff]  ;;  %v115_v3 = vsub.f32 %v83_v60, %v99_v61 }
  0x18   :  { %v142_v39 = vadd.f32 %v141_v34, %v121_v28  ;;  %v129_v4 = vmul.f32 %v113_v57, %v113_v57  ;;  %v116_v6 = vsub.f32 %v84_v1, %v100_v2 }
  0x19   :  { %v130_v7 = vmul.f32 %v114_v62, %v114_v62  ;;  %v131_v9 = vmul.f32 %v115_v3, %v115_v3 }
  0x1a   :  { %v143_v44 = vadd.f32 %v142_v39, %v122_v33  ;;  %v132_v11 = vmul.f32 %v116_v6, %v116_v6 }
  0x1c   :  { %v144_v49 = vadd.f32 %v143_v44, %v123_v38 }
  0x1e   :  { %v145_v54 = vadd.f32 %v144_v49, %v124_v43 }
  0x20   :  { %v146_v59 = vadd.f32 %v145_v54, %v125_v48 }
  0x22   :  { %v147_v0 = vadd.f32 %v146_v59, %v126_v53 }
  0x24   :  { %v148_v5 = vadd.f32 %v147_v0, %v127_v58 }
  0x26   :  { %v149_v8 = vadd.f32 %v148_v5, %v128_v63 }
  0x28   :  { %v150_v10 = vadd.f32 %v149_v8, %v129_v4 }
  0x2a   :  { %v151_v12 = vadd.f32 %v150_v10, %v130_v7 }
  0x2c   :  { %v152_v13 = vadd.f32 %v151_v12, %v131_v9 }
  0x2e   :  { %v153_v14 = vadd.f32 %v152_v13, %v132_v11 }
  0x30   :  { %281 = vadd.xlane.f32.xlu0 %v153_v14 }
  0xa3   :  { %v282_v15 = vpop.xlane.xlu0 %281 }
  0xa4   :  { %v283_v16 = vrot.slane %v282_v15, 4 }
  0xa6   :  { %v284_v17 = vadd.f32 %v283_v16, %v282_v15 }
  0xa8   :  { %v285_v18 = vrot.slane %v284_v17, 2 }
  0xaa   :  { %v286_v19 = vadd.f32 %v285_v18, %v284_v17 }
  0xac   :  { %v287_v20 = vrot.slane %v286_v19, 1 }
  0xae   :  { %v288_v21 = vadd.f32 %v287_v20, %v286_v19 }
  0xb0   :  { %313 = vpush %v288_v21 }
  0xe1   :  { %s314_s22 = spop %313 }
  0xe2   :  { %291 = sst [smem:[#allocation8]] %s314_s22 }
  0xe3   :  { %300 = dma.smem_to_hbm %s390_s23, 16, %s298_s21, [#allocation5]  }
  0xe4   :  { %384 = dma.done.wait [#allocation5], 16  }
  0xe5   :  { %385 = vsyncadd [#allocation5], 4294967280 }
  0xe6   :  { %305 = sfence }
  0xe7   :  { %306 = vsyncpa [#allocation4], 1 }
  0xe8   :  { %307 = vsyncpa [#allocation7], 1 }
  0xe9   :  { %308 = vsyncpa [#allocation5], 1 }

</bundles_post_ra>
